<compile_context>
chip_gen: v7x
topology: tpu7x:2x2x1
jax: 0.10.0
libtpu: 0.0.40
codegen_flags: <defaults>
</compile_context>

<pallas_src>
import functools

import jax
import jax.numpy as jnp
import numpy as np
from jax.experimental import pallas as pl
from jax.experimental.pallas import tpu as pltpu


def fused_lm_head_logprob_kernel(x_ref, w_ref, b_ref, tok_ref,
                                 logits_ref, lp_ref,
                                 m_scr, l_scr, tok_scr,
                                 *, inv_temperature, tn):
    """One (row_tile, vocab_tile) grid step.

    x_ref:      (tm, H)  bf16   row tile of hidden states
    w_ref:      (H, tn)  bf16   vocab tile of LM-head weights
    b_ref:      (1, tn)  f32    vocab tile of bias
    tok_ref:    (tm, 1)  int32  next-token id per row
    logits_ref: (tm, tn) f32    output logits tile
    lp_ref:     (tm,128) f32    logprob per row (broadcast across lanes)
    m/l/tok_scr:(tm, 1)  f32    running max / sum-exp / gathered token logit
    """
    j = pl.program_id(1)

    @pl.when(j == 0)
    def _init():
        m_scr[...] = jnp.full_like(m_scr, -jnp.inf)
        l_scr[...] = jnp.zeros_like(l_scr)
        tok_scr[...] = jnp.zeros_like(tok_scr)

    # MXU: bf16 inputs, f32 accumulation; f32 VPU epilogue (bias + temperature).
    logits = jnp.dot(x_ref[...], w_ref[...], preferred_element_type=jnp.float32)
    logits = (logits + b_ref[...]) * inv_temperature
    logits_ref[...] = logits

    # Online logsumexp over vocab tiles.
    m_prev = m_scr[...]
    m_new = jnp.maximum(m_prev, jnp.max(logits, axis=-1, keepdims=True))
    l_scr[...] = (l_scr[...] * jnp.exp(m_prev - m_new)
                  + jnp.sum(jnp.exp(logits - m_new), axis=-1, keepdims=True))
    m_scr[...] = m_new

    # Gather the logit at the next-token id using a tile-local iota
    # (global vocab id = j * tn + local column id).
    col = jax.lax.broadcasted_iota(jnp.int32, logits.shape, 1) + j * tn
    tok = tok_ref[...]                                       # (tm, 1) int32
    tok_scr[...] += jnp.sum(jnp.where(col == tok, logits, 0.0),
                            axis=-1, keepdims=True)

    # Finalize on the last vocab tile; lane-dense (unmasked) store.
    @pl.when(j == pl.num_programs(1) - 1)
    def _finalize():
        lse = m_scr[...] + jnp.log(l_scr[...])
        lp = tok_scr[...] - lse                              # (tm, 1)
        lp_ref[...] = jnp.broadcast_to(lp, lp_ref.shape)


def _pick_tile(dim, candidates):
    for c in candidates:
        if dim % c == 0:
            return c
    return dim


def policy_forward(sequences, embed_table, w_lm, b_lm, temperature,
                   *, tm=None, tn=None):
    """Mirrors Policy.forward: returns dict(logits=..., logprobs=...)."""
    B, T = sequences.shape
    V, H = embed_table.shape
    inv_temp = 1.0 / float(temperature)

    # Glue: synthetic base-model trunk (embedding lookup standing in for the
    # HF transformer; no clean Pallas equivalent for the full model body).
    hidden = embed_table[sequences].astype(jnp.float32)      # (B, T, H)

    # Only positions :-1 are returned by the module; never compute the rest.
    N = B * (T - 1)
    x = hidden[:, :-1, :].reshape(N, H)
    next_tok = sequences[:, 1:].reshape(N, 1).astype(jnp.int32)

    if tm is None:
        tm = _pick_tile(N, (256, 128, 64, 32, 16, 8))
    if tn is None:
        tn = _pick_tile(V, (512, 256, 128))
    assert N % tm == 0 and tm % 8 == 0, (N, tm)
    assert V % tn == 0 and tn % 128 == 0, (V, tn)
    # TODO(synk): for very large H the K (hidden) dimension should also be
    # tiled with an f32 accumulator and last-K-gated epilogue; H here is small
    # enough to keep K resident per block.

    x_bf = x.astype(jnp.bfloat16)
    w_bf = w_lm.astype(jnp.bfloat16)
    b2 = b_lm.reshape(1, V).astype(jnp.float32)

    grid = (N // tm, V // tn)
    kernel = functools.partial(fused_lm_head_logprob_kernel,
                               inv_temperature=inv_temp, tn=tn)

    logits_flat, lp_lanes = pl.pallas_call(
        kernel,
        grid=grid,
        in_specs=[
            pl.BlockSpec((tm, H), lambda i, j: (i, 0)),      # x row tile
            pl.BlockSpec((H, tn), lambda i, j: (0, j)),      # W vocab tile
            pl.BlockSpec((1, tn), lambda i, j: (0, j)),      # bias vocab tile
            pl.BlockSpec((tm, 1), lambda i, j: (i, 0)),      # next-token ids
        ],
        out_specs=[
            pl.BlockSpec((tm, tn), lambda i, j: (i, j)),     # logits tile
            pl.BlockSpec((tm, 128), lambda i, j: (i, 0)),    # logprobs (resident over j)
        ],
        out_shape=[
            jax.ShapeDtypeStruct((N, V), jnp.float32),
            jax.ShapeDtypeStruct((N, 128), jnp.float32),
        ],
        scratch_shapes=[
            pltpu.VMEM((tm, 1), jnp.float32),                # running max
            pltpu.VMEM((tm, 1), jnp.float32),                # running sum-exp
            pltpu.VMEM((tm, 1), jnp.float32),                # gathered token logit
        ],
        compiler_params=pltpu.CompilerParams(
            dimension_semantics=("parallel", "arbitrary"),
            vmem_limit_bytes=48 * 1024 * 1024,
        ),
    )(x_bf, w_bf, b2, next_tok)

    logits = logits_flat.reshape(B, T - 1, V)
    # TODO(synk): responses_vec response-span masking is undefined in the
    # reference (compute_logprobs body not given); per-token logprobs are
    # returned for all T-1 positions.
    logprobs = lp_lanes[:, 0].reshape(B, T - 1)
    return dict(logits=logits, logprobs=logprobs)


if __name__ == "__main__":
    # Small deterministic setup: B=2, T=9 tokens, H=128 hidden, V=512 vocab.
    # tm=8, tn=256 gives a (2, 2) grid: exercises multiple row tiles (scratch
    # re-init) and multiple vocab tiles (online logsumexp accumulation).
    B, T, H, V = 2, 9, 128, 512
    temperature = 0.7

    key = jax.random.PRNGKey(0)
    k_emb, k_w, k_b, k_seq = jax.random.split(key, 4)

    embed_table = jax.random.normal(k_emb, (V, H), jnp.float32) * 0.02
    w_lm = jax.random.normal(k_w, (H, V), jnp.float32) * 0.02
    b_lm = jax.random.normal(k_b, (V,), jnp.float32) * 0.01
    sequences = jax.random.randint(k_seq, (B, T), 0, V, dtype=jnp.int32)

    out = policy_forward(sequences, embed_table, w_lm, b_lm, temperature,
                         tm=8, tn=256)
    jax.block_until_ready(out)

    # Pure-JAX reference with the same bf16 rounding of the MXU inputs.
    hidden = embed_table[sequences][:, :-1, :]
    x_bf = hidden.astype(jnp.bfloat16).astype(jnp.float32)
    w_bf = w_lm.astype(jnp.bfloat16).astype(jnp.float32)
    ref_logits = (x_bf @ w_bf + b_lm) / temperature            # (B, T-1, V)
    ref_lp = jax.nn.log_softmax(ref_logits, axis=-1)
    ref_logprobs = jnp.take_along_axis(
        ref_lp, sequences[:, 1:, None], axis=-1)[..., 0]

    np.testing.assert_allclose(np.asarray(out["logits"]),
                               np.asarray(ref_logits), rtol=1e-4, atol=1e-5)
    np.testing.assert_allclose(np.asarray(out["logprobs"]),
                               np.asarray(ref_logprobs), rtol=1e-4, atol=1e-5)

    print("KERNEL_OK")
</pallas_src>

<mosaic_0001>
module attributes {stable_mosaic.version = 11 : i64} {
  func.func @fused_lm_head_logprob_kernel(%arg0: i32, %arg1: i32, %arg2: memref<8x128xbf16, #tpu.memory_space<vmem>>, %arg3: memref<128x256xbf16, #tpu.memory_space<vmem>>, %arg4: memref<1x256xf32, #tpu.memory_space<vmem>>, %arg5: memref<8x1xi32, #tpu.memory_space<vmem>>, %arg6: memref<8x256xf32, #tpu.memory_space<vmem>>, %arg7: memref<8x128xf32, #tpu.memory_space<vmem>>, %arg8: memref<8x1xf32, #tpu.memory_space<vmem>>, %arg9: memref<8x1xf32, #tpu.memory_space<vmem>>, %arg10: memref<8x1xf32, #tpu.memory_space<vmem>>) attributes {dimension_semantics = [#tpu.dimension_semantics<parallel>, #tpu.dimension_semantics<arbitrary>], iteration_bounds = array<i64: 2, 2>, scalar_prefetch = 0 : i64, scratch_operands = 3 : i64, tpu.core_type = #tpu.core_type<tc>, window_params = [{transform_indices = @transform_0, window_bounds = array<i64: 8, 128>}, {transform_indices = @transform_1, window_bounds = array<i64: 128, 256>}, {transform_indices = @transform_2, window_bounds = array<i64: 1, 256>}, {transform_indices = @transform_3, window_bounds = array<i64: 8, 1>}, {transform_indices = @transform_4, window_bounds = array<i64: 8, 256>}, {transform_indices = @transform_5, window_bounds = array<i64: 8, 128>}]} {
    %c0_i32 = arith.constant 0 : i32
    %0 = arith.cmpi eq, %arg1, %c0_i32 : i32
    %1 = arith.extui %0 : i1 to i32
    %c0_i32_0 = arith.constant 0 : i32
    %2 = arith.cmpi ne, %1, %c0_i32_0 : i32
    scf.if %2 {
      %cst_28 = arith.constant 0xFF800000 : f32
      %45 = vector.broadcast %cst_28 : f32 to vector<8x1xf32>
      %c0_29 = arith.constant 0 : index
      %c0_30 = arith.constant 0 : index
      %46 = vector.load %arg8[%c0_29, %c0_30] : memref<8x1xf32, #tpu.memory_space<vmem>>, vector<8x1xf32>
      tpu.vector_store %arg8[%c0_29, %c0_30], %45 {strides = array<i32>} : memref<8x1xf32, #tpu.memory_space<vmem>>, vector<8x1xf32>,
      %cst_31 = arith.constant 0.000000e+00 : f32
      %47 = vector.broadcast %cst_31 : f32 to vector<8x1xf32>
      %c0_32 = arith.constant 0 : index
      %c0_33 = arith.constant 0 : index
      %48 = vector.load %arg9[%c0_32, %c0_33] : memref<8x1xf32, #tpu.memory_space<vmem>>, vector<8x1xf32>
      tpu.vector_store %arg9[%c0_32, %c0_33], %47 {strides = array<i32>} : memref<8x1xf32, #tpu.memory_space<vmem>>, vector<8x1xf32>,
      %cst_34 = arith.constant 0.000000e+00 : f32
      %49 = vector.broadcast %cst_34 : f32 to vector<8x1xf32>
      %c0_35 = arith.constant 0 : index
      %c0_36 = arith.constant 0 : index
      %50 = vector.load %arg10[%c0_35, %c0_36] : memref<8x1xf32, #tpu.memory_space<vmem>>, vector<8x1xf32>
      tpu.vector_store %arg10[%c0_35, %c0_36], %49 {strides = array<i32>} : memref<8x1xf32, #tpu.memory_space<vmem>>, vector<8x1xf32>,
    } else {
    }
    %c0 = arith.constant 0 : index
    %c0_1 = arith.constant 0 : index
    %3 = vector.load %arg2[%c0, %c0_1] : memref<8x128xbf16, #tpu.memory_space<vmem>>, vector<8x128xbf16>
    %c0_2 = arith.constant 0 : index
    %c0_3 = arith.constant 0 : index
    %4 = vector.load %arg3[%c0_2, %c0_3] : memref<128x256xbf16, #tpu.memory_space<vmem>>, vector<128x256xbf16>
    %cst = arith.constant dense<0.000000e+00> : vector<8x256xf32>
    %5 = tpu.matmul %3, %4, %cst {dimension_numbers = #tpu.dot_dimension_numbers<[1], [0], [0], [1], [0, 0, 1, 1], [], []>} : vector<8x128xbf16>, vector<128x256xbf16>, vector<8x256xf32> -> vector<8x256xf32>
    %c0_4 = arith.constant 0 : index
    %c0_5 = arith.constant 0 : index
    %6 = vector.load %arg4[%c0_4, %c0_5] : memref<1x256xf32, #tpu.memory_space<vmem>>, vector<1x256xf32>
    %7 = vector.broadcast %6 : vector<1x256xf32> to vector<8x256xf32>
    %8 = arith.addf %5, %7 : vector<8x256xf32>
    %cst_6 = arith.constant 1.42857146 : f32
    %9 = vector.broadcast %cst_6 : f32 to vector<8x256xf32>
    %10 = arith.mulf %8, %9 : vector<8x256xf32>
    %c0_7 = arith.constant 0 : index
    %c0_8 = arith.constant 0 : index
    %11 = vector.load %arg6[%c0_7, %c0_8] : memref<8x256xf32, #tpu.memory_space<vmem>>, vector<8x256xf32>
    tpu.vector_store %arg6[%c0_7, %c0_8], %10 {strides = array<i32>} : memref<8x256xf32, #tpu.memory_space<vmem>>, vector<8x256xf32>,
    %c0_9 = arith.constant 0 : index
    %c0_10 = arith.constant 0 : index
    %12 = vector.load %arg8[%c0_9, %c0_10] : memref<8x1xf32, #tpu.memory_space<vmem>>, vector<8x1xf32>
    %cst_11 = arith.constant dense<0xFF800000> : vector<8xf32>
    %13 = vector.multi_reduction <maximumf>, %10, %cst_11 [1] : vector<8x256xf32> to vector<8xf32>
    %14 = vector.shape_cast %13 : vector<8xf32> to vector<8x1xf32>
    %15 = arith.maximumf %12, %14 : vector<8x1xf32>
    %c0_12 = arith.constant 0 : index
    %c0_13 = arith.constant 0 : index
    %16 = vector.load %arg9[%c0_12, %c0_13] : memref<8x1xf32, #tpu.memory_space<vmem>>, vector<8x1xf32>
    %17 = arith.subf %12, %15 : vector<8x1xf32>
    %18 = math.exp %17 : vector<8x1xf32>
    %19 = arith.mulf %16, %18 : vector<8x1xf32>
    %20 = vector.broadcast %15 : vector<8x1xf32> to vector<8x256xf32>
    %21 = arith.subf %10, %20 : vector<8x256xf32>
    %22 = math.exp %21 : vector<8x256xf32>
    %cst_14 = arith.constant dense<0.000000e+00> : vector<8xf32>
    %23 = vector.multi_reduction <add>, %22, %cst_14 [1] : vector<8x256xf32> to vector<8xf32>
    %24 = vector.shape_cast %23 : vector<8xf32> to vector<8x1xf32>
    %25 = arith.addf %19, %24 : vector<8x1xf32>
    %c0_15 = arith.constant 0 : index
    %c0_16 = arith.constant 0 : index
    %26 = vector.load %arg9[%c0_15, %c0_16] : memref<8x1xf32, #tpu.memory_space<vmem>>, vector<8x1xf32>
    tpu.vector_store %arg9[%c0_15, %c0_16], %25 {strides = array<i32>} : memref<8x1xf32, #tpu.memory_space<vmem>>, vector<8x1xf32>,
    %c0_17 = arith.constant 0 : index
    %c0_18 = arith.constant 0 : index
    %27 = vector.load %arg8[%c0_17, %c0_18] : memref<8x1xf32, #tpu.memory_space<vmem>>, vector<8x1xf32>
    tpu.vector_store %arg8[%c0_17, %c0_18], %15 {strides = array<i32>} : memref<8x1xf32, #tpu.memory_space<vmem>>, vector<8x1xf32>,
    %28 = tpu.iota {dimensions = array<i32: 1>} : vector<8x256xi32>
    %c256_i32 = arith.constant 256 : i32
    %29 = arith.muli %arg1, %c256_i32 : i32
    %30 = vector.broadcast %29 : i32 to vector<8x256xi32>
    %31 = arith.addi %28, %30 : vector<8x256xi32>
    %c0_19 = arith.constant 0 : index
    %c0_20 = arith.constant 0 : index
    %32 = vector.load %arg5[%c0_19, %c0_20] : memref<8x1xi32, #tpu.memory_space<vmem>>, vector<8x1xi32>
    %c0_21 = arith.constant 0 : index
    %c0_22 = arith.constant 0 : index
    %33 = vector.load %arg10[%c0_21, %c0_22] : memref<8x1xf32, #tpu.memory_space<vmem>>, vector<8x1xf32>
    %34 = vector.broadcast %32 : vector<8x1xi32> to vector<8x256xi32>
    %35 = arith.cmpi eq, %31, %34 : vector<8x256xi32>
    %cst_23 = arith.constant 0.000000e+00 : f32
    %36 = vector.broadcast %cst_23 : f32 to vector<8x256xf32>
    %37 = arith.select %35, %10, %36 : vector<8x256xi1>, vector<8x256xf32>
    %cst_24 = arith.constant dense<0.000000e+00> : vector<8xf32>
    %38 = vector.multi_reduction <add>, %37, %cst_24 [1] : vector<8x256xf32> to vector<8xf32>
    %39 = vector.shape_cast %38 : vector<8xf32> to vector<8x1xf32>
    %40 = arith.addf %33, %39 : vector<8x1xf32>
    %c0_25 = arith.constant 0 : index
    %c0_26 = arith.constant 0 : index
    %41 = vector.load %arg10[%c0_25, %c0_26] : memref<8x1xf32, #tpu.memory_space<vmem>>, vector<8x1xf32>
    tpu.vector_store %arg10[%c0_25, %c0_26], %40 {strides = array<i32>} : memref<8x1xf32, #tpu.memory_space<vmem>>, vector<8x1xf32>,
    %c1_i32 = arith.constant 1 : i32
    %42 = arith.cmpi eq, %arg1, %c1_i32 : i32
    %43 = arith.extui %42 : i1 to i32
    %c0_i32_27 = arith.constant 0 : i32
    %44 = arith.cmpi ne, %43, %c0_i32_27 : i32
    scf.if %44 {
      %c0_28 = arith.constant 0 : index
      %c0_29 = arith.constant 0 : index
      %45 = vector.load %arg8[%c0_28, %c0_29] : memref<8x1xf32, #tpu.memory_space<vmem>>, vector<8x1xf32>
      %c0_30 = arith.constant 0 : index
      %c0_31 = arith.constant 0 : index
      %46 = vector.load %arg9[%c0_30, %c0_31] : memref<8x1xf32, #tpu.memory_space<vmem>>, vector<8x1xf32>
      %47 = math.log %46 : vector<8x1xf32>
      %48 = arith.addf %45, %47 : vector<8x1xf32>
      %c0_32 = arith.constant 0 : index
      %c0_33 = arith.constant 0 : index
      %49 = vector.load %arg10[%c0_32, %c0_33] : memref<8x1xf32, #tpu.memory_space<vmem>>, vector<8x1xf32>
      %50 = arith.subf %49, %48 : vector<8x1xf32>
      %51 = vector.shape_cast %50 : vector<8x1xf32> to vector<8x1xf32>
      %52 = vector.broadcast %51 : vector<8x1xf32> to vector<8x128xf32>
      %c0_34 = arith.constant 0 : index
      %c0_35 = arith.constant 0 : index
      %53 = vector.load %arg7[%c0_34, %c0_35] : memref<8x128xf32, #tpu.memory_space<vmem>>, vector<8x128xf32>
      tpu.vector_store %arg7[%c0_34, %c0_35], %52 {strides = array<i32>} : memref<8x128xf32, #tpu.memory_space<vmem>>, vector<8x128xf32>,
    } else {
    }
    return
  }
  func.func @transform_0(%arg0: i32, %arg1: i32) -> (i32, i32) {
    %c0_i32 = arith.constant 0 : i32
    %c0_i32_0 = arith.constant 0 : i32
    return %arg0, %c0_i32 : i32, i32
  }
  func.func @transform_1(%arg0: i32, %arg1: i32) -> (i32, i32) {
    %c0_i32 = arith.constant 0 : i32
    %c0_i32_0 = arith.constant 0 : i32
    return %c0_i32, %arg1 : i32, i32
  }
  func.func @transform_2(%arg0: i32, %arg1: i32) -> (i32, i32) {
    %c0_i32 = arith.constant 0 : i32
    %c0_i32_0 = arith.constant 0 : i32
    return %c0_i32, %arg1 : i32, i32
  }
  func.func @transform_3(%arg0: i32, %arg1: i32) -> (i32, i32) {
    %c0_i32 = arith.constant 0 : i32
    %c0_i32_0 = arith.constant 0 : i32
    return %arg0, %c0_i32 : i32, i32
  }
  func.func @transform_4(%arg0: i32, %arg1: i32) -> (i32, i32) {
    %c0_i32 = arith.constant 0 : i32
    return %arg0, %arg1 : i32, i32
  }
  func.func @transform_5(%arg0: i32, %arg1: i32) -> (i32, i32) {
    %c0_i32 = arith.constant 0 : i32
    %c0_i32_0 = arith.constant 0 : i32
    return %arg0, %c0_i32 : i32, i32
  }
}

</mosaic_0001>

<bundles_post_ra>
// kernel: tpu_custom_call.1
= control target key start
LH: loop header
LB: loop body
LE: loop exit
PB: predicated region body
PF: predicated region fallthrough
CT: control target
= control target key end

     0   :  { %s1558_s0 = inlined_call_operand.vmem [shape: bf16[16,128], index: 0, kind: input, shape index: {}]   ;;  %s1559_s1 = inlined_call_operand.hbm [shape: bf16[128,512], index: 1, kind: input, shape index: {}]   ;;  %s1560_s2 = inlined_call_operand.vmem [shape: f32[1,512], index: 2, kind: input, shape index: {}]   ;;  %s1561_s3 = inlined_call_operand.vmem [shape: s32[16,1], index: 3, kind: input, shape index: {}]   ;;  %s1562_s4 = inlined_call_operand.hbm [shape: f32[16,512], index: 4, kind: output, shape index: {0}]   ;;  %s1563_s5 = inlined_call_operand.hbm [shape: f32[16,128], index: 5, kind: output, shape index: {1}]  }
   0x1   :  { %1580 = sst [smem:[#allocation29_spill]] %s1559_s1 }
   0x2   :  { %11 = vsyncpa [#allocation6], 0 }
   0x3   :  { %13 = vsyncpa [#allocation6 + $0x1], 0 }
   0x4   :  { %14 = vsyncpa [#allocation7], 0 }
   0x5   :  { %16 = vsyncpa [#allocation7 + $0x1], 0 }
   0x6   :  { %17 = vsyncpa [#allocation10], 0 }
   0x7   :  { %19 = vsyncpa [#allocation10 + $0x1], 0  ;;  %s1201_s18 = smov 0   ;;  %s1203_s19 = smov 0  }
   0x8   :  { %s1205_s20 = smov 0   ;;  %s1207_s21 = smov 0  }
   0x9   :  { %s1209_s22 = smov 0   ;;  %s1211_s23 = smov 0  }
   0xa   :  { %s1213_s24 = smov 0   ;;  %s1215_s25 = smov 0  }
   0xb   :  { %s1217_s26 = smov 0   ;;  %s1219_s27 = smov 0  }
   0xc   :  { %s1221_s28 = smov 0   ;;  %s1223_s29 = smov 0  }
   0xd   :  { %s1225_s30 = smov 0   ;;  %s1227_s6 = smov 0  }
   0xe LB: > { %1581 = sst [smem:[#allocation14_spill]] %s1107_s18  ;;  %s736_s7 = sadd.s32 4294967295, %s1159_s6   ;;  %s1159_s6 = sphi %s1227_s6, %s25_s6   ;;  %s1155_s30 = sphi %s1225_s30, %s1625_s30   ;;  %s1151_s29 = sphi %s1223_s29, %s1624_s29   ;;  %s1147_s28 = sphi %s1221_s28, %s1623_s28   ;;  %s1143_s27 = sphi %s1219_s27, %s1622_s27   ;;  %s1139_s26 = sphi %s1217_s26, %s1621_s26   ;;  %s1135_s25 = sphi %s1215_s25, %s1620_s25   ;;  %s1131_s24 = sphi %s1213_s24, %s1619_s24   ;;  %s1127_s23 = sphi %s1211_s23, %s1618_s23   ;;  %s1123_s22 = sphi %s1209_s22, %s1629_s22   ;;  %s1119_s21 = sphi %s1207_s21, %s1628_s21   ;;  %s1115_s20 = sphi %s1205_s20, %s1616_s20   ;;  %s1111_s19 = sphi %s1203_s19, %s1627_s19   ;;  %s1107_s18 = sphi %s1201_s18, %s1626_s18  }
   0xf   : > { %1582 = sst [smem:[#allocation15_spill]] %s1115_s20  ;;  %s737_s8 = sadd.s32 4294967294, %s1159_s6  }
  0x10   : > { %1583 = sst [smem:[#allocation16_spill]] %s1119_s21  ;;  %s34_s9 = sadd.s32 1, %s1151_s29 }
  0x11   : > { %1584 = sst [smem:[#allocation17_spill]] %s1127_s23  ;;  %s37_s10 = sadd.s32 1, %s1155_s30 }
  0x12   : > { %1585 = sst [smem:[#allocation18_spill]] %s1135_s25  ;;  %p35_p0 = scmp.ge.s32.totalorder %s34_s9, 2 }
  0x13   : > { %1586 = sst [smem:[#allocation19_spill]] %s1139_s26  ;;  %s70_s11 = sadd.s32 1, %s1139_s26 }
  0x14   : > { %1587 = sst [smem:[#allocation20_spill]] %s1151_s29  ;;  %p77_p1 = scmp.ne.s32.totalorder %s1139_s26, %s1135_s25 }
  0x15   : > { %1588 = sst [smem:[#allocation21_spill]] %s1155_s30  ;;  %p78_p2 = scmp.eq.s32.totalorder %s1159_s6, 0 }
  0x16   : > { %s1631_s9 = smov (%p35_p0, %s34_s9), 0  ;;  %s1633_s10 = smov (!%p35_p0, %s37_s10), %s1155_s30 }
  0x17   : > { %1589 = sst [smem:[#allocation22_spill]] %s1631_s9  ;;  %s67_s12 = ssub.s32 %s1151_s29, %s1631_s9 }
  0x18   : > { %p1282_p3 = por %p78_p2, %p77_p1  ;;  %p39_p4 = scmp.ge.s32.totalorder %s1633_s10, 2 }
  0x19   : > { %p68_p5 = scmp.eq.s32.totalorder %s67_s12, 0  ;;  %p83_p6 = scmp.ne.s32.totalorder %s1135_s25, %s1131_s24 }
  0x1a   : > { %p84_p7 = scmp.eq.s32.totalorder %s736_s7, 0  ;;  %s1635_s10 = smov (%p39_p4, %s1633_s10), 0 }
  0x1b   : > { %1591 = sst [smem:[#allocation23_spill]] %s1635_s10  ;;  %s145_s16 = ssub.s32 %s1155_s30, %s1635_s10 }
  0x1c   : > { %s1290_s14 = scalar_select %p68_p5, %s1139_s26, %s70_s11  }
  0x1d   : > { %p1292_p8 = por %p84_p7, %p83_p6  ;;  %s147_s17 = sor.u32 %s145_s16, %s67_s12 }
  0x1e   : > { %1592 = sst [smem:[#allocation24_spill]] %s1290_s14  ;;  %s150_s24 = sadd.s32 1, %s1127_s23 }
  0x1f   : > { %p148_p9 = scmp.eq.s32.totalorder %s147_s17, 0  ;;  %p160_p10 = scmp.ne.s32.totalorder %s1127_s23, %s1123_s22 }
  0x20   : > { %p161_p11 = scmp.eq.s32.totalorder %s736_s7, 3  ;;  %p166_p12 = scmp.ne.s32.totalorder %s1123_s22, %s1119_s21 }
  0x21   : > { %s1304_s9 = scalar_select %p148_p9, %s1127_s23, %s150_s24  }
  0x22   : > { %p1306_p13 = por %p161_p11, %p160_p10  ;;  %p167_p0 = scmp.eq.s32.totalorder %s737_s8, 3 }
  0x23   : > { %1594 = sst [smem:[#allocation25_spill]] %s1304_s9  ;;  %p174_p1 = scmp.eq.s32.totalorder %s145_s16, 0 }
  0x24   : > { %s1595_s11 = scalar_select %p1306_p13, 1, 0 }
  0x25   : > { %s176_s10 = sadd.s32 1, %s1115_s20  ;;  %p1311_p2 = por %p167_p0, %p166_p12 }
  0x26   : > { %p186_p4 = scmp.ne.s32.totalorder %s1115_s20, %s1111_s19  ;;  %p192_p6 = scmp.ne.s32.totalorder %s1111_s19, %s1107_s18 }
  0x27   : > { %s1596_s12 = scalar_select %p1311_p2, 1, 0 }
  0x28   : > { %s1318_s17 = scalar_select %p174_p1, %s1115_s20, %s176_s10  }
  0x29   : > { %1597 = sst [smem:[#allocation26_spill]] %s1596_s12  ;;  %p1320_p5 = por %p186_p4, %p161_p11 }
  0x2a   : > { %1598 = sst [smem:[#allocation27_spill]] %s1318_s17  ;;  %p795_p7 = scmp.lt.s32.totalorder %s1159_s6, 4 }
  0x2b   : > { %s1599_s7 = scalar_select %p1320_p5, 1, 0 }
  0x2c   : > { %p1327_p9 = por %p192_p6, %p167_p0  ;;  %s220_s8 = sand.u32 1, %s1139_s26  }
  0x2d   : > { %s740_s16 = sshll.u32 %s220_s8, 7  ;;  %s777_s30 = sshll.u32 %s1151_s29, 7 }
  0x2e   : > { %s1600_s24 = scalar_select %p1327_p9, 1, 0 }
  0x2f   : > { %s1602_s1 = sld [smem:[#allocation29_spill]]  ;;  %s224_s10 = scalar_lea.vmem [#allocation5], %s740_s16 }
  0x30   : > { %1601 = sst [smem:[#allocation28_spill]] %s1600_s24  ;;  %s231_s17 = sshll.u32 %s224_s10, 4  ;;  %s1338_s17 = int_to_ptr.vmem [resolvable:$true] %s231_s17 }
  0x31   : > { %p1342_p10 = pnand %p795_p7, %p1282_p3  ;;  %s1346_s29 = scalar_lea.sflag [#allocation6], %s220_s8 }
  0x33   : > { %p953_p12 = pneg %p1342_p10 }
  0x35   : > { %s1336_s23 = scalar_lea.hbm %s1602_s1, %s777_s30  ;;  %s956_s13 = scalar_lea.hbm %s1602_s1, 4096 }
  0x36   : > { %s951_s9 = scalar_lea.hbm %s1336_s23, 2048  ;;  %p957_p3 = scmp.lt.u32.totalorder %s1336_s23, %s1602_s1 }
  0x37   : > { %p952_p11 = scmp.ne.s32.totalorder %s1336_s23, %s951_s9  ;;  %p958_p4 = scmp.lt.u32.totalorder %s956_s13, %s951_s9 }
  0x38   : > { %p960_p7 = scmp.lt.u32.totalorder %s951_s9, %s1336_s23 }
  0x39   : > { %p954_p0 = pnand %p953_p12, %p952_p11  ;;  %p959_p6 = por %p958_p4, %p957_p3 }
  0x3b   : > { %p955_p1 = pneg %p954_p0  ;;  %p961_p9 = por %p960_p7, %p959_p6 }
  0x3d   : > { %p962_p2 = pnand %p961_p9, %p955_p1 }
  0x3f   : > { %965 = shalt.err (!%p962_p2)
}
  0x40   : > { %s966_s8 = scalar_lea.vmem %s1338_s17, 2048  ;;  %s1161_s30 = smov [#allocation5]  }
  0x41   : > { %p967_p11 = scmp.ne.s32.totalorder %s1338_s17, %s966_s8  ;;  %s971_s14 = sshll.u32 %s1161_s30, 4  ;;  %s972_s14 = int_to_ptr.vmem [resolvable:$false] %s971_s14 }
  0x42   : > { %s973_s16 = scalar_lea.vmem %s972_s14, 4096  ;;  %p974_p13 = scmp.lt.s32.totalorder %s1338_s17, %s972_s14 }
  0x43   : > { %p969_p0 = pnand %p967_p11, %p953_p12  ;;  %p975_p3 = scmp.lt.s32.totalorder %s973_s16, %s966_s8 }
  0x45   : > { %p970_p5 = pneg %p969_p0  ;;  %p976_p4 = por %p975_p3, %p974_p13 }
  0x47   : > { %p977_p6 = pnand %p976_p4, %p970_p5 }
  0x49   : > { %980 = shalt.err (!%p977_p6)
}
  0x4a   : > { %s1162_s9 = smov 256   ;;  %s1163_s13 = smov 128  }
  0x4b   : > { %s1164_s10 = smov 8   ;;  %p743_p2 = scmp.ge.s32.totalorder %s1159_s6, 1 }
  0x4c   : > { %787 = dma.hbm_to_vmem [thread:$0]  (!%p1342_p10), %s1336_s23, 2048, %s1338_s17, %s1346_s29, %s1162_s9, %s1163_s13, %s1164_s10  }
  0x4d   : > { %p254_p9 = scmp.lt.s32.totalorder %s1159_s6, 5 }
  0x4f   : > { %p255_p12 = pnand %p743_p2, %p254_p9 }
  0x50   : > { %s260_s8 = sand.u32 (!%p255_p12), 1, %s1135_s25  }
  0x51   : > { %258 = sbr.rel (%p255_p12) target bundleno = 1001 (0x3e9), region = 36  ;;  %s744_s30 = sshll.u32 (!%p255_p12), %s260_s8, 7 }
  0x52   : > { %s261_s14 = scalar_lea.sflag (!%p255_p12), [#allocation6], %s260_s8  ;;  %s1377_s16 = scalar_lea.vmem (!%p255_p12), [#allocation5], %s744_s30 }
  0x58   : > { %1094 = dma.done.wait (%p1292_p8), %s261_s14, 2048  }
  0x59   : > { %1096 = vsyncadd (%p1292_p8), %s261_s14, 4294965248  ;;  %s1572_s20 = sand.u32 1, %s1123_s22   ;;  %s1573_s23 = sand.u32 1, %s1111_s19  }
  0x5a   : > { %s745_s29 = sshll.u32 %s1572_s20, 4  ;;  %s1389_s17 = sshll.u32 %s1573_s23, 3 }
  0x5b   : > { %p308_p13 = scmp.lt.s32.totalorder %s1147_s28, 1  ;;  %s1393_s9 = sshll.u32 %s1143_s27, 1 }
  0x5c   : > { %p314_p8 = scmp.lt.s32.totalorder %s1393_s9, 3  ;;  %s1414_s12 = scalar_lea.vmem [#allocation8], %s745_s29 }
  0x5d   : > { %s309_s15 = scalar_select %p308_p13, %s1147_s28, 1 }
  0x5e   : > { %s1398_s13 = scalar_select %p314_p8, %s1393_s9, 3 }
  0x5f   : > { %s747_s10 = sshll.u32 %s309_s15, 2  ;;  %s749_s8 = sshll.u32 %s309_s15, 3 }
  0x60   : > { %s1403_s20 = scalar_lea.vmem %s1558_s0, %s747_s10  ;;  %s316_s26 = scalar_lea.vmem %s1560_s2, %s1398_s13 }
  0x61   : > { %s1412_s18 = scalar_lea.vmem %s1561_s3, %s749_s8  ;;  %s307_s21 = scalar_lea.vmem [#allocation9], %s1389_s17 }
  0x62   : > { %p750_p5 = scmp.ne.s32.totalorder %s1143_s27, 0 }
  0x63   : > { %vm328_vm0 = vcmask (!%p750_p5), 7168   ;;  %v1165_v0 = vmov (!%p750_p5), -inf   ;;  %v1166_v1 = vmov (!%p750_p5), 0.0  }
  0x64   : > { %327 = sbr.rel (%p750_p5) target bundleno = 107 (0x6b), region = 44  ;;  %329 = vst.msk [vmem:[#allocation2] sm:$0xff] (!%p750_p5), %vm328_vm0, %v1165_v0  ;;  %330 = vst.msk [vmem:[#allocation3] sm:$0xff] (!%p750_p5), %vm328_vm0, %v1166_v1 }
  0x65   : > { %331 = vst.msk [vmem:[#allocation4] sm:$0xff] (!%p750_p5), %vm328_vm0, %v1166_v1 }
  0x6b PF: > { %v918_v2 = vld [vmem:[%s1377_s16 + $0x4] ss:$8 sps:$4 sm:$0xff]   ;;  %v920_v3 = vld [vmem:[%s1377_s16] ss:$8 sps:$4 sm:$0xff]   ;;  %v1167_v4 = vmov 0   ;;  %v351_v21 = vlaneseq  ;;  %vm511_vm1 = vcmask 7168  }
  0x6c   : > { %473 = vmatprep.mubr.bf16.mxu0 %v1167_v4  ;;  %917 = vset.pattern.permute.xlu1 %v1167_v4  ;;  %v921_v5 = vld [vmem:[%s1377_s16 + $0x14] ss:$8 sps:$4 sm:$0xff]   ;;  %v923_v6 = vld [vmem:[%s1377_s16 + $0x10] ss:$8 sps:$4 sm:$0xff]   ;;  %v924_v7 = vld [vmem:[%s1377_s16 + $0x24] ss:$8 sps:$4 sm:$0xff]  }
  0x6d   : > { %441 = vmatprep.subr.bf16.mxu0 %v918_v2  ;;  %916 = vset.pattern.permute.xlu0 %v1167_v4  ;;  %v926_v8 = vld [vmem:[%s1377_s16 + $0x20] ss:$8 sps:$4 sm:$0xff]   ;;  %v927_v9 = vld [vmem:[%s1377_s16 + $0x34] ss:$8 sps:$4 sm:$0xff]   ;;  %v929_v10 = vld [vmem:[%s1377_s16 + $0x30] ss:$8 sps:$4 sm:$0xff]  }
  0x6e   : > { %442 = vmatpush1.bf16.msra.mxu0 %v920_v3  ;;  %v521_v11 = vld [vmem:[%s1412_s18] sm:$0xff]  ;;  %v933_v14 = vld [vmem:[%s1377_s16 + $0x54] ss:$8 sps:$4 sm:$0xff]   ;;  %v935_v15 = vld [vmem:[%s1377_s16 + $0x50] ss:$8 sps:$4 sm:$0xff]   ;;  %v352_v22 = vshrl.u32 %v351_v21, 7 }
  0x6f   : > { %443 = vmatprep.subr.bf16.mxu0 %v921_v5  ;;  %v930_v12 = vld [vmem:[%s1377_s16 + $0x44] ss:$8 sps:$4 sm:$0xff]   ;;  %524 = vperm.xlu1 %917, %v521_v11   ;;  %v932_v13 = vld [vmem:[%s1377_s16 + $0x40] ss:$8 sps:$4 sm:$0xff]   ;;  %v939_v18 = vld [vmem:[%s1377_s16 + $0x74] ss:$8 sps:$4 sm:$0xff]  }
  0x70   : > { %v936_v16 = vld [vmem:[%s1377_s16 + $0x64] ss:$8 sps:$4 sm:$0xff]   ;;  %v938_v17 = vld [vmem:[%s1377_s16 + $0x60] ss:$8 sps:$4 sm:$0xff]   ;;  %v941_v19 = vld [vmem:[%s1377_s16 + $0x70] ss:$8 sps:$4 sm:$0xff]  }
  0x71   : > { %v332_v20 = vld [vmem:[%s1403_s20] sm:$0xf]  ;;  %v353_v23 = vsub.s32 0, %v352_v22  ;;  %v357_v25 = vsub.s32 1, %v352_v22  ;;  %v515_v44 = vand.u32 127, %v351_v21  ;;  %s767_s25 = sshll.u32 %s1143_s27, 8 }
  0x72   : > { %444 = vmatpush1.bf16.msra.mxu0 %v923_v6  ;;  %v349_v24 = vld [vmem:[%s316_s26] sm:$0x3]  ;;  %v518_v48 = vstv %s767_s25  ;;  %v491_v60 = vld [vmem:[#allocation3] sm:$0xff]  ;;  %v522_v0 = vld [vmem:[#allocation4] sm:$0xff]  ;;  %p768_p10 = scmp.ne.s32.totalorder %s1143_s27, 1 }
  0x73   : > { %445 = vmatprep.subr.bf16.mxu0 %v924_v7  ;;  %v354_v26 = vrot.slane %v349_v24, %v353_v23  ;;  %v358_v27 = vrot.slane %v349_v24, %v357_v25  ;;  %v486_v37 = vld [vmem:[#allocation2] sm:$0xff]  ;;  %v516_v47 = vadd.s32 128, %v515_v44  ;;  %v519_v49 = vadd.s32 %v518_v48, %v515_v44 }
  0x74   : > { %v1168_v4 = vmov (!%p768_p10), 0  }
  0x75   : > { %v520_v50 = vadd.s32 %v518_v48, %v516_v47 }
  0x76   : > { %446 = vmatpush1.bf16.msra.mxu0 %v926_v8 }
  0x77   : > { %447 = vmatprep.subr.bf16.mxu0 %v927_v9 }
  0x7a   : > { %448 = vmatpush1.bf16.msra.mxu0 %v929_v10 }
  0x7b   : > { %449 = vmatprep.subr.bf16.mxu0 %v930_v12 }
  0x7e   : > { %450 = vmatpush1.bf16.msra.mxu0 %v932_v13 }
  0x7f   : > { %451 = vmatprep.subr.bf16.mxu0 %v933_v14 }
  0x82   : > { %452 = vmatpush1.bf16.msra.mxu0 %v935_v15 }
  0x83   : > { %453 = vmatprep.subr.bf16.mxu0 %v936_v16 }
  0x86   : > { %454 = vmatpush1.bf16.msra.mxu0 %v938_v17 }
  0x87   : > { %455 = vmatprep.subr.bf16.mxu0 %v939_v18 }
  0x8a   : > { %456 = vmatpush1.bf16.msra.mxu0 %v941_v19 }
  0x8d   : > { %474 = vmatmul.mubr.bf16.vlgmr.msra.gmra.mrb[0].mxu0 %v332_v20 }
  0xee   : > { %v525_v51 = vpop.permute.xlu1 %524 }
  0xef   : > { %vm526_vm2 = vcmp.eq.s32.totalorder %v519_v49, %v525_v51  ;;  %vm527_vm3 = vcmp.eq.s32.totalorder %v520_v50, %v525_v51 }
 0x160   : > { %v475_v28 = vpop.f32.mrb[0].mxu0 }
 0x161   : > { %v476_v29 = vadd.f32 %v475_v28, %v354_v26  ;;  %v477_v30 = vpop.f32.mrb[1].mxu0 }
 0x162   : > { %v478_v31 = vadd.f32 %v477_v30, %v358_v27  ;;  %v479_v32 = vpop.f32.mrb[2].mxu0 }
 0x163   : > { %v482_v33 = vmul.f32 1.4285715, %v476_v29  ;;  %v480_v34 = vpop.f32.mrb[3].mxu0 }
 0x164   : > { %v483_v35 = vmul.f32 1.4285715, %v478_v31 }
 0x165   : > { %484 = vst [vmem:[%s1414_s12] sm:$0xff] %v482_v33  ;;  %v528_v55 = vsel %vm526_vm2, %v482_v33, 0.0 }
 0x166   : > { %485 = vst [vmem:[%s1414_s12 + $0x8] sm:$0xff] %v483_v35  ;;  %v487_v36 = vmax.f32 %v482_v33, %v483_v35  ;;  %v529_v56 = vsel %vm527_vm3, %v483_v35, 0.0 }
 0x167   : > { %v530_v57 = vadd.f32 %v529_v56, %v528_v55 }
 0x168   : > { %488 = vmax.xlane.f32.xlu0 %v487_v36 }
 0x1f5   : > { %v489_v38 = vpop.xlane.xlu0 %488 }
 0x1f6   : > { %v490_v39 = vmax.f32 %v486_v37, %v489_v38 }
 0x1f8   : > { %v492_v40 = vsub.f32 %v486_v37, %v490_v39  ;;  %513 = vst.msk [vmem:[#allocation2] sm:$0xff] %vm511_vm1, %v490_v39  ;;  %498 = vperm.xlu0 %916, %v490_v39  }
 0x1fa   : > { %v493_v58 = vmul.f32 1.442695, %v492_v40 }
 0x1fc   : > { %948 = vset.pattern.permute.xlu0 (!%p768_p10), %v1168_v4 }
 0x1ff   : > { %v539_v6 = vld [vmem:[#allocation2] sm:$0xff] (!%p768_p10) }
 0x277   : > { %v499_v41 = vpop.permute.xlu0 %498 }
 0x278   : > { %v501_v42 = vsub.f32 %v482_v33, %v499_v41  ;;  %v502_v43 = vsub.f32 %v483_v35, %v499_v41 }
 0x27a   : > { %v503_v45 = vmul.f32 1.442695, %v501_v42  ;;  %v505_v46 = vmul.f32 1.442695, %v502_v43 }
 0x27c   : > { %942 = vpow2.f32 %v503_v45 }
 0x27d   : > { %944 = vpow2.f32 %v505_v46 }
 0x27e   : > { %946 = vpow2.f32 %v493_v58 }
 0x286   : > { %v943_v52 = vpop.eup %942 }
 0x287   : > { %v945_v53 = vpop.eup %944 }
 0x288   : > { %v507_v54 = vadd.f32 %v945_v53, %v943_v52  ;;  %v947_v59 = vpop.eup %946 }
 0x289   : > { %v495_v61 = vmul.f32 %v947_v59, %v491_v60 }
 0x28a   : > { %508 = vadd.xlane.f32.xlu1 %v507_v54 }
 0x28e   : > { %531 = vadd.xlane.f32.xlu1 %v530_v57 }
 0x317   : > { %v509_v62 = vpop.xlane.xlu1 %508 }
 0x318   : > { %v510_v63 = vadd.f32 %v509_v62, %v495_v61  ;;  %538 = sbr.rel (%p768_p10) target bundleno = 948 (0x3b4), region = 48 }
 0x31a   : > { %512 = vst.msk [vmem:[#allocation3] sm:$0xff] %vm511_vm1, %v510_v63 }
 0x31b   : > { %v532_v1 = vpop.xlane.xlu1 %531 }
 0x31c   : > { %v533_v2 = vadd.f32 %v532_v1, %v522_v0 }
 0x31e   : > { %534 = vst.msk [vmem:[#allocation4] sm:$0xff] %vm511_vm1, %v533_v2 }
 0x321   : > { %v540_v3 = vld [vmem:[#allocation3] sm:$0xff] }
 0x322   : > { %949 = vlog2.f32 %v540_v3 }
 0x325   : > { %v544_v8 = vld [vmem:[#allocation4] sm:$0xff] }
 0x32c   : > { %v950_v5 = vpop.eup %949 }
 0x32d   : > { %v542_v7 = vmul.f32 0.6931472, %v950_v5 }
 0x32f   : > { %v543_v9 = vadd.f32 %v542_v7, %v539_v6 }
 0x331   : > { %v545_v10 = vsub.f32 %v544_v8, %v543_v9 }
 0x333   : > { %548 = vperm.xlu0 %948, %v545_v10  }
 0x3b2   : > { %v549_v11 = vpop.permute.xlu0 %548 }
 0x3b3   : > { %551 = vst [vmem:[%s307_s21] sm:$0xff] %v549_v11 }
 0x3b4 PF: > { %s772_s26 = sshll.u32 %s1147_s28, 2  ;;  %s574_s24 = sshll.u32 %s1414_s12, 4  ;;  %s1453_s24 = int_to_ptr.vmem [resolvable:$true] %s574_s24 }
 0x3b5   : > { %s570_s27 = sadd.s32 %s772_s26, %s1393_s9  ;;  %s1604_s15 = sand.u32 1, %s1123_s22  }
 0x3b6   : > { %s773_s16 = sshll.u32 %s570_s27, 7  ;;  %s553_s13 = scalar_lea.sflag [#allocation7], %s1604_s15 }
 0x3b7   : > { %s572_s29 = scalar_lea.hbm %s1562_s4, %s773_s16  ;;  %s981_s10 = scalar_lea.vmem %s1453_s24, 256 }
 0x3b8   : > { %p982_p1 = scmp.ne.s32.totalorder %s1453_s24, %s981_s10  ;;  %p1605_p7 = scmp.ne.s32.totalorder %s1595_s11, 0 }
 0x3b9   : > { %s1169_s8 = smov [#allocation8]  }
 0x3ba   : > { %p983_p11 = pnand %p982_p1, %p1605_p7  ;;  %s985_s9 = sshll.u32 %s1169_s8, 4  ;;  %s986_s9 = int_to_ptr.vmem [resolvable:$false] %s985_s9 }
 0x3bb   : > { %s987_s12 = scalar_lea.vmem %s986_s9, 512  ;;  %p988_p3 = scmp.lt.s32.totalorder %s1453_s24, %s986_s9 }
 0x3bc   : > { %p984_p0 = pneg %p983_p11  ;;  %p989_p4 = scmp.lt.s32.totalorder %s987_s12, %s981_s10 }
 0x3be   : > { %p990_p6 = por %p989_p4, %p988_p3 }
 0x3c0   : > { %p991_p2 = pnand %p990_p6, %p984_p0 }
 0x3c2   : > { %994 = shalt.err (!%p991_p2)
}
 0x3c3   : > { %s995_s30 = scalar_lea.hbm %s572_s29, 256  ;;  %s999_s18 = scalar_lea.hbm %s1562_s4, 1024 }
 0x3c4   : > { %p996_p9 = scmp.ne.s32.totalorder %s572_s29, %s995_s30  ;;  %p1000_p8 = scmp.lt.u32.totalorder %s572_s29, %s1562_s4 }
 0x3c5   : > { %p1001_p5 = scmp.lt.u32.totalorder %s999_s18, %s995_s30  ;;  %p1003_p1 = scmp.lt.u32.totalorder %s995_s30, %s572_s29 }
 0x3c6   : > { %p997_p12 = pnand %p996_p9, %p1605_p7 }
 0x3c7   : > { %p1002_p10 = por %p1001_p5, %p1000_p8 }
 0x3c8   : > { %p998_p13 = pneg %p997_p12 }
 0x3c9   : > { %p1004_p11 = por %p1003_p1, %p1002_p10 }
 0x3cb   : > { %p1005_p0 = pnand %p1004_p11, %p998_p13 }
 0x3cd   : > { %1008 = shalt.err (!%p1005_p0)
}
 0x3ce   : > { %780 = dma.vmem_to_hbm [thread:$0]  (%p1605_p7), %s1453_s24, 256, %s572_s29, %s553_s13  }
 0x3cf   : > { %s774_s27 = sshll.u32 %s1147_s28, 7  ;;  %s587_s16 = sshll.u32 %s307_s21, 4  ;;  %s588_s16 = int_to_ptr.vmem [resolvable:$true] %s587_s16 }
 0x3d0   : > { %s1482_s15 = scalar_lea.hbm %s1563_s5, %s774_s27  ;;  %s1606_s10 = sand.u32 1, %s1111_s19  }
 0x3d1   : > { %s558_s8 = scalar_lea.sflag [#allocation10], %s1606_s10  ;;  %s1009_s9 = scalar_lea.vmem %s588_s16, 128 }
 0x3d2   : > { %p1010_p3 = scmp.ne.s32.totalorder %s588_s16, %s1009_s9  ;;  %p1607_p4 = scmp.ne.s32.totalorder %s1599_s7, 0 }
 0x3d3   : > { %s1170_s11 = smov [#allocation9]  }
 0x3d4   : > { %p1011_p6 = pnand %p1010_p3, %p1607_p4  ;;  %s1013_s12 = sshll.u32 %s1170_s11, 4  ;;  %s1014_s12 = int_to_ptr.vmem [resolvable:$false] %s1013_s12 }
 0x3d5   : > { %s1015_s24 = scalar_lea.vmem %s1014_s12, 256  ;;  %p1016_p7 = scmp.lt.s32.totalorder %s588_s16, %s1014_s12 }
 0x3d6   : > { %p1012_p2 = pneg %p1011_p6  ;;  %p1017_p9 = scmp.lt.s32.totalorder %s1015_s24, %s1009_s9 }
 0x3d8   : > { %p1018_p12 = por %p1017_p9, %p1016_p7 }
 0x3da   : > { %p1019_p13 = pnand %p1018_p12, %p1012_p2 }
 0x3dc   : > { %1022 = shalt.err (!%p1019_p13)
}
 0x3dd   : > { %s1023_s21 = scalar_lea.hbm %s1482_s15, 128  ;;  %s1027_s29 = scalar_lea.hbm %s1563_s5, 256 }
 0x3de   : > { %p1024_p8 = scmp.ne.s32.totalorder %s1482_s15, %s1023_s21  ;;  %p1028_p1 = scmp.lt.u32.totalorder %s1482_s15, %s1563_s5 }
 0x3df   : > { %p1029_p11 = scmp.lt.u32.totalorder %s1027_s29, %s1023_s21  ;;  %p1031_p3 = scmp.lt.u32.totalorder %s1023_s21, %s1482_s15 }
 0x3e0   : > { %p1025_p5 = pnand %p1024_p8, %p1607_p4 }
 0x3e1   : > { %p1030_p0 = por %p1029_p11, %p1028_p1 }
 0x3e2   : > { %p1026_p10 = pneg %p1025_p5 }
 0x3e3   : > { %p1032_p6 = por %p1031_p3, %p1030_p0 }
 0x3e5   : > { %p1033_p2 = pnand %p1032_p6, %p1026_p10 }
 0x3e7   : > { %1036 = shalt.err (!%p1033_p2)
}
 0x3e8   : > { %781 = dma.vmem_to_hbm [thread:$0]  (%p1607_p4), %s588_s16, 128, %s1482_s15, %s558_s8  }
 0x3e9 PF: > { %s1608_s14 = sld [smem:[#allocation16_spill]]  ;;  %s1609_s1 = sld [smem:[#allocation26_spill]] }
 0x3ea   : > { %p796_p7 = scmp.ge.s32.totalorder %s1159_s6, 2 }
 0x3ef   : > { %s599_s18 = sand.u32 1, %s1608_s14   ;;  %p1610_p9 = scmp.ne.s32.totalorder %s1609_s1, 0 }
 0x3f0   : > { %s600_s25 = scalar_lea.sflag [#allocation7], %s599_s18 }
 0x3f1   : > { %p789_p12 = pnand %p796_p7, %p1610_p9 }
 0x3f3   : > { %1098 = dma.done.wait (!%p789_p12), %s600_s25, 256  }
 0x3f4   : > { %1100 = vsyncadd (!%p789_p12), %s600_s25, 4294967040  ;;  %s1611_s26 = sld [smem:[#allocation14_spill]]  ;;  %s1612_s27 = sld [smem:[#allocation28_spill]] }
 0x3fa   : > { %s608_s20 = sand.u32 1, %s1611_s26   ;;  %p1613_p13 = scmp.ne.s32.totalorder %s1612_s27, 0 }
 0x3fb   : > { %s609_s23 = scalar_lea.sflag [#allocation10], %s608_s20 }
 0x3fc   : > { %p792_p8 = pnand %p796_p7, %p1613_p13 }
 0x3fe   : > { %1102 = dma.done.wait (!%p792_p8), %s609_s23, 128  }
 0x3ff   : > { %1104 = vsyncadd (!%p792_p8), %s609_s23, 4294967168  ;;  %s25_s6 = sadd.s32 1, %s1159_s6   ;;  %s1615_s16 = sld [smem:[#allocation15_spill]] }
 0x400   : > { %p1511_p4 = scmp.ge.s32.totalorder %s25_s6, 6   ;;  %s1616_s20 = sld [smem:[#allocation27_spill]] }
 0x401   : > { %s1617_s15 = sld [smem:[#allocation17_spill]]  ;;  %s1619_s24 = sld [smem:[#allocation18_spill]] }
 0x402   : > { %s1618_s23 = sld [smem:[#allocation25_spill]]  ;;  %s1620_s25 = sld [smem:[#allocation19_spill]] }
 0x403   : > { %s1621_s26 = sld [smem:[#allocation24_spill]]  ;;  %s1622_s27 = sld [smem:[#allocation20_spill]] }
 0x404   : > { %s1623_s28 = sld [smem:[#allocation21_spill]]  ;;  %s1624_s29 = sld [smem:[#allocation22_spill]] }
 0x405   : > { %s1625_s30 = sld [smem:[#allocation23_spill]]  ;;  %s1626_s18 = smov %s1111_s19 }
 0x406   : > { %s1627_s19 = smov %s1615_s16  ;;  %s1628_s21 = smov %s1123_s22 }
 0x407   : > { %s1629_s22 = smov %s1617_s15  ;;  %24 = sbr.rel (!%p1511_p4) target bundleno = 14 (0xe), region = 115 }
 0x40e   :  { %614 = vsyncpa [#allocation6], 1 }
 0x40f   :  { %616 = vsyncpa [#allocation6 + $0x1], 1 }
 0x410   :  { %617 = vsyncpa [#allocation7], 1 }
 0x411   :  { %619 = vsyncpa [#allocation7 + $0x1], 1 }
 0x412   :  { %620 = vsyncpa [#allocation10], 1 }
 0x413   :  { %622 = vsyncpa [#allocation10 + $0x1], 1 }

</bundles_post_ra>
